<compile_context>
chip_gen: v7x
topology: tpu7x:2x2x1
jax: 0.10.0
libtpu: 0.0.40
codegen_flags: <defaults>
</compile_context>

<pallas_src>
import numpy as np

import jax
import jax.numpy as jnp
from jax.experimental import pallas as pl
from jax.experimental.pallas import tpu as pltpu


# ----------------------------------------------------------------------------- #
# Helpers
# ----------------------------------------------------------------------------- #
def _round_up(x, m):
    return ((x + m - 1) // m) * m


def _choose_batch_tile(B, block_b):
    """Pick batch tile Bt (multiple of 16) and padded batch Bp.

    Ensures >=2 grid steps whenever possible so the 'parallel' batch axis can
    shard across both TensorCores on v7x (no effect on v5e/v6e single-TC)."""
    Bt = max(16, _round_up(min(block_b, B), 16))
    Bp = _round_up(B, Bt)
    if Bp // Bt < 2 and Bp > 16:
        Bt = max(16, _round_up((Bp + 1) // 2, 16))
        Bp = _round_up(B, Bt)
    return Bt, Bp


# ----------------------------------------------------------------------------- #
# Kernel
# ----------------------------------------------------------------------------- #
def make_bcauss_kernel(n_stages, relu_until, w_pad):
    """Fused forward: h -> (h @ W_s) with per-stage lane-masked ReLU.

    Biases are folded into W via the constant-1 lane at column w_pad-1."""

    def kernel(x_ref, w_ref, out_ref):
        lane = jax.lax.broadcasted_iota(jnp.int32, (1, w_pad), 1)  # 1 vreg row
        h = x_ref[...]                                             # [Bt, W_PAD] bf16
        for s in range(n_stages):                                  # fully unrolled
            w = w_ref[pl.ds(s * w_pad, w_pad), :]                  # [W_PAD, W_PAD] bf16
            z = jnp.dot(h, w, preferred_element_type=jnp.float32)  # MXU, f32 acc
            ru = relu_until[s]
            if ru is None:                    # no activation this stage
                a = z
            elif ru >= w_pad:                 # ReLU on every lane
                a = jnp.maximum(z, 0.0)
            else:                             # ReLU only on lanes [0, ru)
                a = jnp.where(lane < ru, jnp.maximum(z, 0.0), z)
            if s < n_stages - 1:
                h = a.astype(jnp.bfloat16)    # back to bf16 for next MXU stage
            else:
                out_ref[...] = a              # final stage: f32, lane-dense store

    return kernel


# ----------------------------------------------------------------------------- #
# Host-side packing of all layers into block-diagonal stage slabs (bias folded)
# ----------------------------------------------------------------------------- #
def pack_params(params, structure_params, p, keys):
    G = len(keys)
    Ls = [structure_params[k]["hidden_layers"] for k in keys]
    Is = [structure_params[k]["input_size"] for k in keys]
    Hs = [structure_params[k]["hidden_size"] for k in keys]
    Os = [structure_params[k]["output_size"] for k in keys]
    L_max = max(Ls)
    sum_I, sum_O = sum(Is), sum(Os)
    npl = p["neurons_per_layer"]
    nply = p["neurons_per_layerYs"]

    widths = [sum_I, sum(Hs), sum_O + G, npl + G, 2 * nply + 1 + G, 3 + G]
    # +1 reserves one free lane (W_PAD-1) for the constant-1 / bias column.
    W_PAD = max(128, _round_up(max(widths) + 1, 128))
    CONST = W_PAD - 1

    n_stages = L_max + 5
    Ws = np.zeros((n_stages, W_PAD, W_PAD), np.float32)
    relu_until = []

    in_off = np.cumsum([0] + Is)
    h_off = np.cumsum([0] + Hs)
    o_off = np.cumsum([0] + Os)

    def A(x):
        return np.asarray(jax.device_get(x), np.float32)

    def set_bias(s, col_start, b):
        b = A(b).reshape(-1)
        Ws[s, CONST, col_start:col_start + b.shape[0]] = b

    # constant-1 lane propagates through every stage
    for s in range(n_stages):
        Ws[s, CONST, CONST] = 1.0

    # --- stage 0: first hidden layer of every group (block-diagonal), ReLU all
    for g, k in enumerate(keys):
        w, b = params["groups"][k][0]
        Ws[0, in_off[g]:in_off[g] + Is[g], h_off[g]:h_off[g] + Hs[g]] = A(w)
        set_bias(0, h_off[g], b)
    relu_until.append(W_PAD)

    # --- stages 1 .. L_max-1: hidden->hidden; identity padding for shallow groups
    for d in range(1, L_max):
        for g, k in enumerate(keys):
            sl = slice(h_off[g], h_off[g] + Hs[g])
            if d < Ls[g]:
                w, b = params["groups"][k][d]
                Ws[d, sl, sl] = A(w)
                set_bias(d, h_off[g], b)
            else:
                Ws[d, sl, sl] = np.eye(Hs[g], dtype=np.float32)   # ReLU(h@I)==h, h>=0
        relu_until.append(W_PAD)

    # --- stage L_max: representation heads (ReLU) + direct heads (linear)
    s = L_max
    for g, k in enumerate(keys):
        w_rep, b_rep = params["groups"][k][Ls[g]]
        w_dir, b_dir = params["groups"][k][Ls[g] + 1]
        Ws[s, h_off[g]:h_off[g] + Hs[g], o_off[g]:o_off[g] + Os[g]] = A(w_rep)
        set_bias(s, o_off[g], b_rep)
        Ws[s, h_off[g]:h_off[g] + Hs[g], sum_O + g] = A(w_dir).reshape(-1)
        Ws[s, CONST, sum_O + g] = A(b_dir).reshape(-1)[0]
    relu_until.append(sum_O)          # ReLU only on rep lanes, not on directs

    # --- stage L_max+1: merge layer (no activation) + direct passthrough
    s = L_max + 1
    w, b = params["merge"]
    Ws[s, 0:sum_O, 0:npl] = A(w)
    set_bias(s, 0, b)
    for g in range(G):
        Ws[s, sum_O + g, npl + g] = 1.0
    relu_until.append(None)

    # --- stage L_max+2: [y0_0 | y1_0 | t] fused + direct passthrough
    s = L_max + 2
    w, b = params["y0_0"]; Ws[s, 0:npl, 0:nply] = A(w); set_bias(s, 0, b)
    w, b = params["y1_0"]; Ws[s, 0:npl, nply:2 * nply] = A(w); set_bias(s, nply, b)
    w, b = params["t"];    Ws[s, 0:npl, 2 * nply] = A(w).reshape(-1)
    Ws[s, CONST, 2 * nply] = A(b).reshape(-1)[0]
    for g in range(G):
        Ws[s, npl + g, 2 * nply + 1 + g] = 1.0
    relu_until.append(2 * nply)       # ReLU on y0h/y1h lanes only

    # --- stage L_max+3: block-diag [y0_1, y1_1] + t/direct passthrough
    s = L_max + 3
    w, b = params["y0_1"]; Ws[s, 0:nply, 0:nply] = A(w); set_bias(s, 0, b)
    w, b = params["y1_1"]; Ws[s, nply:2 * nply, nply:2 * nply] = A(w); set_bias(s, nply, b)
    Ws[s, 2 * nply, 2 * nply] = 1.0
    for g in range(G):
        Ws[s, 2 * nply + 1 + g, 2 * nply + 1 + g] = 1.0
    relu_until.append(2 * nply)

    # --- stage L_max+4: final fused head -> lanes [y0, y1, t_logit, directs...]
    s = L_max + 4
    w, b = params["y0_2"]; Ws[s, 0:nply, 0] = A(w).reshape(-1); Ws[s, CONST, 0] = A(b).reshape(-1)[0]
    w, b = params["y1_2"]; Ws[s, nply:2 * nply, 1] = A(w).reshape(-1); Ws[s, CONST, 1] = A(b).reshape(-1)[0]
    Ws[s, 2 * nply, 2] = 1.0
    for g in range(G):
        Ws[s, 2 * nply + 1 + g, 3 + g] = 1.0
    relu_until.append(None)

    w_slab = jnp.asarray(Ws.reshape(n_stages * W_PAD, W_PAD), jnp.bfloat16)
    meta = {"relu_until": relu_until, "n_stages": n_stages, "w_pad": W_PAD,
            "const_lane": CONST, "sum_in": sum_I, "n_out": 3 + G}
    return w_slab, meta


# ----------------------------------------------------------------------------- #
# Wrapper
# ----------------------------------------------------------------------------- #
def bcauss_forward_pallas(Xs, params, structure_params, p, block_b=512):
    keys = sorted(Xs.keys())
    B = Xs[keys[0]].shape[0]

    w_slab, meta = pack_params(params, structure_params, p, keys)
    n_stages, W_PAD = meta["n_stages"], meta["w_pad"]

    # Pack group inputs into one lane-padded slab with a constant-1 bias lane.
    x = jnp.concatenate([Xs[k] for k in keys], axis=1).astype(jnp.float32)
    x = jnp.pad(x, ((0, 0), (0, W_PAD - x.shape[1])))
    x = x.at[:, meta["const_lane"]].set(1.0)
    x = x.astype(jnp.bfloat16)

    Bt, Bp = _choose_batch_tile(B, block_b)
    x = jnp.pad(x, ((0, Bp - B), (0, 0)))     # padded rows: garbage, sliced off

    kernel = make_bcauss_kernel(n_stages, meta["relu_until"], W_PAD)

    out = pl.pallas_call(
        kernel,
        out_shape=jax.ShapeDtypeStruct((Bp, W_PAD), jnp.float32),
        grid_spec=pltpu.PrefetchScalarGridSpec(
            num_scalar_prefetch=0,
            grid=(Bp // Bt,),
            in_specs=[
                pl.BlockSpec((Bt, W_PAD), lambda i: (i, 0)),                # activations
                pl.BlockSpec((n_stages * W_PAD, W_PAD), lambda i: (0, 0)),  # weight slab (resident)
            ],
            out_specs=pl.BlockSpec((Bt, W_PAD), lambda i: (i, 0)),
        ),
        compiler_params=pltpu.CompilerParams(
            dimension_semantics=("parallel",),   # batch axis shards across TCs on v7x
        ),
    )(x, w_slab)

    res = out[:B, :meta["n_out"]]
    # sigmoid on the single t column, done outside the kernel (negligible cost)
    res = jnp.concatenate([res[:, :2], jax.nn.sigmoid(res[:, 2:3]), res[:, 3:]], axis=1)
    return res


# ----------------------------------------------------------------------------- #
# Deterministic parameter construction (PyTorch-Linear-style uniform init)
# ----------------------------------------------------------------------------- #
def _init_linear(key, fan_in, fan_out):
    k1, k2 = jax.random.split(key)
    bound = 1.0 / float(fan_in) ** 0.5
    w = jax.random.uniform(k1, (fan_in, fan_out), jnp.float32, -bound, bound)
    b = jax.random.uniform(k2, (1, fan_out), jnp.float32, -bound, bound)
    return w, b


def build_params(key, p, structure_params):
    params = {"groups": {}}
    for k in sorted(structure_params.keys()):
        v = structure_params[k]
        layers = []
        key, sub = jax.random.split(key)
        layers.append(_init_linear(sub, v["input_size"], v["hidden_size"]))
        for _ in range(v["hidden_layers"] - 1):
            key, sub = jax.random.split(key)
            layers.append(_init_linear(sub, v["hidden_size"], v["hidden_size"]))
        key, sub = jax.random.split(key)
        layers.append(_init_linear(sub, v["hidden_size"], v["output_size"]))  # representation
        key, sub = jax.random.split(key)
        layers.append(_init_linear(sub, v["hidden_size"], 1))                 # direct output
        params["groups"][k] = layers

    n_output_nodes = sum(v["output_size"] for v in structure_params.values())
    key, sub = jax.random.split(key)
    params["merge"] = _init_linear(sub, n_output_nodes, p["neurons_per_layer"])
    key, sub = jax.random.split(key)
    params["t"] = _init_linear(sub, p["neurons_per_layer"], 1)
    for head in ("y0", "y1"):
        key, s0 = jax.random.split(key)
        key, s1 = jax.random.split(key)
        key, s2 = jax.random.split(key)
        params[f"{head}_0"] = _init_linear(s0, p["neurons_per_layer"], p["neurons_per_layerYs"])
        params[f"{head}_1"] = _init_linear(s1, p["neurons_per_layerYs"], p["neurons_per_layerYs"])
        params[f"{head}_2"] = _init_linear(s2, p["neurons_per_layerYs"], 1)
    return params


# ----------------------------------------------------------------------------- #
# Pure-JAX f32 reference (mirrors the PyTorch forward exactly)
# ----------------------------------------------------------------------------- #
def bcauss_forward_ref(Xs, params, structure_params):
    keys = sorted(Xs.keys())
    reps, directs = [], []
    for k in keys:
        layers = params["groups"][k]
        h = Xs[k]
        for (w, b) in layers[:-2]:
            h = jnp.maximum(h @ w + b, 0.0)
        w, b = layers[-2]
        reps.append(jnp.maximum(h @ w + b, 0.0))
        w, b = layers[-1]
        directs.append(h @ w + b)
    x = jnp.concatenate(reps, axis=1)
    w, b = params["merge"]
    x = x @ w + b
    w, b = params["t"]
    t_pred = jax.nn.sigmoid(x @ w + b)

    def head(x, prefix):
        y = x
        for i in range(3):
            w, b = params[f"{prefix}_{i}"]
            y = y @ w + b
            if i < 2:
                y = jnp.maximum(y, 0.0)
        return y

    y0_pred = head(x, "y0")
    y1_pred = head(x, "y1")
    return jnp.concatenate([y0_pred, y1_pred, t_pred] + directs, axis=1)


# ----------------------------------------------------------------------------- #
# Main
# ----------------------------------------------------------------------------- #
if __name__ == "__main__":
    p = {"neurons_per_layer": 32, "neurons_per_layerYs": 16}
    structure_params = {
        "groupA": {"input_size": 16, "hidden_size": 32, "hidden_layers": 2, "output_size": 16},
        "groupB": {"input_size": 8,  "hidden_size": 32, "hidden_layers": 1, "output_size": 8},
    }
    batch = 40          # not a multiple of the batch block -> exercises padding + 2-step grid

    root = jax.random.PRNGKey(0)
    k_params, k_a, k_b = jax.random.split(root, 3)
    params = build_params(k_params, p, structure_params)
    Xs = {
        "groupA": jax.random.normal(k_a, (batch, 16), jnp.float32),
        "groupB": jax.random.normal(k_b, (batch, 8), jnp.float32),
    }

    out = jax.block_until_ready(
        bcauss_forward_pallas(Xs, params, structure_params, p))
    ref = jax.block_until_ready(bcauss_forward_ref(Xs, params, structure_params))

    assert out.shape == (batch, 3 + len(structure_params)), out.shape
    # bf16 MXU operands (f32 accumulation): tolerance at bf16 level vs f32 ref.
    max_err = float(jnp.max(jnp.abs(out - ref)))
    assert jnp.allclose(out, ref, rtol=3e-2, atol=3e-2), max_err

    print("KERNEL_OK")
</pallas_src>

<mosaic_0001>
module attributes {stable_mosaic.version = 11 : i64} {
  func.func @kernel(%arg0: i32, %arg1: memref<32x128xbf16, #tpu.memory_space<vmem>>, %arg2: memref<896x128xbf16, #tpu.memory_space<vmem>>, %arg3: memref<32x128xf32, #tpu.memory_space<vmem>>) attributes {dimension_semantics = [#tpu.dimension_semantics<parallel>], iteration_bounds = array<i64: 2>, scalar_prefetch = 0 : i64, scratch_operands = 0 : i64, tpu.core_type = #tpu.core_type<tc>, window_params = [{transform_indices = @transform_0, window_bounds = array<i64: 32, 128>}, {pipeline_mode = #tpu.pipeline_mode<synchronous>, transform_indices = @transform_1, window_bounds = array<i64: 896, 128>}, {transform_indices = @transform_2, window_bounds = array<i64: 32, 128>}]} {
    %0 = tpu.iota {dimensions = array<i32: 1>} : vector<1x128xi32>
    %c0 = arith.constant 0 : index
    %c0_0 = arith.constant 0 : index
    %1 = vector.load %arg1[%c0, %c0_0] : memref<32x128xbf16, #tpu.memory_space<vmem>>, vector<32x128xbf16>
    %c0_1 = arith.constant 0 : index
    %c0_2 = arith.constant 0 : index
    %2 = vector.load %arg2[%c0_1, %c0_2] : memref<896x128xbf16, #tpu.memory_space<vmem>>, vector<128x128xbf16>
    %cst = arith.constant dense<0.000000e+00> : vector<32x128xf32>
    %3 = tpu.matmul %1, %2, %cst {dimension_numbers = #tpu.dot_dimension_numbers<[1], [0], [0], [1], [0, 0, 1, 1], [], []>} : vector<32x128xbf16>, vector<128x128xbf16>, vector<32x128xf32> -> vector<32x128xf32>
    %cst_3 = arith.constant 0.000000e+00 : f32
    %4 = vector.broadcast %cst_3 : f32 to vector<32x128xf32>
    %5 = arith.maximumf %3, %4 : vector<32x128xf32>
    %6 = arith.truncf %5 : vector<32x128xf32> to vector<32x128xbf16>
    %c128 = arith.constant 128 : index
    %c0_4 = arith.constant 0 : index
    %7 = vector.load %arg2[%c128, %c0_4] : memref<896x128xbf16, #tpu.memory_space<vmem>>, vector<128x128xbf16>
    %cst_5 = arith.constant dense<0.000000e+00> : vector<32x128xf32>
    %8 = tpu.matmul %6, %7, %cst_5 {dimension_numbers = #tpu.dot_dimension_numbers<[1], [0], [0], [1], [0, 0, 1, 1], [], []>} : vector<32x128xbf16>, vector<128x128xbf16>, vector<32x128xf32> -> vector<32x128xf32>
    %cst_6 = arith.constant 0.000000e+00 : f32
    %9 = vector.broadcast %cst_6 : f32 to vector<32x128xf32>
    %10 = arith.maximumf %8, %9 : vector<32x128xf32>
    %11 = arith.truncf %10 : vector<32x128xf32> to vector<32x128xbf16>
    %c256 = arith.constant 256 : index
    %c0_7 = arith.constant 0 : index
    %12 = vector.load %arg2[%c256, %c0_7] : memref<896x128xbf16, #tpu.memory_space<vmem>>, vector<128x128xbf16>
    %cst_8 = arith.constant dense<0.000000e+00> : vector<32x128xf32>
    %13 = tpu.matmul %11, %12, %cst_8 {dimension_numbers = #tpu.dot_dimension_numbers<[1], [0], [0], [1], [0, 0, 1, 1], [], []>} : vector<32x128xbf16>, vector<128x128xbf16>, vector<32x128xf32> -> vector<32x128xf32>
    %c24_i32 = arith.constant 24 : i32
    %14 = vector.broadcast %c24_i32 : i32 to vector<1x128xi32>
    %15 = arith.cmpi slt, %0, %14 : vector<1x128xi32>
    %cst_9 = arith.constant 0.000000e+00 : f32
    %16 = vector.broadcast %cst_9 : f32 to vector<32x128xf32>
    %17 = arith.maximumf %13, %16 : vector<32x128xf32>
    %18 = vector.shape_cast %15 : vector<1x128xi1> to vector<1x128xi1>
    %19 = vector.broadcast %18 : vector<1x128xi1> to vector<32x128xi1>
    %20 = arith.select %19, %17, %13 : vector<32x128xi1>, vector<32x128xf32>
    %21 = arith.truncf %20 : vector<32x128xf32> to vector<32x128xbf16>
    %c384 = arith.constant 384 : index
    %c0_10 = arith.constant 0 : index
    %22 = vector.load %arg2[%c384, %c0_10] : memref<896x128xbf16, #tpu.memory_space<vmem>>, vector<128x128xbf16>
    %cst_11 = arith.constant dense<0.000000e+00> : vector<32x128xf32>
    %23 = tpu.matmul %21, %22, %cst_11 {dimension_numbers = #tpu.dot_dimension_numbers<[1], [0], [0], [1], [0, 0, 1, 1], [], []>} : vector<32x128xbf16>, vector<128x128xbf16>, vector<32x128xf32> -> vector<32x128xf32>
    %24 = arith.truncf %23 : vector<32x128xf32> to vector<32x128xbf16>
    %c512 = arith.constant 512 : index
    %c0_12 = arith.constant 0 : index
    %25 = vector.load %arg2[%c512, %c0_12] : memref<896x128xbf16, #tpu.memory_space<vmem>>, vector<128x128xbf16>
    %cst_13 = arith.constant dense<0.000000e+00> : vector<32x128xf32>
    %26 = tpu.matmul %24, %25, %cst_13 {dimension_numbers = #tpu.dot_dimension_numbers<[1], [0], [0], [1], [0, 0, 1, 1], [], []>} : vector<32x128xbf16>, vector<128x128xbf16>, vector<32x128xf32> -> vector<32x128xf32>
    %c32_i32 = arith.constant 32 : i32
    %27 = vector.broadcast %c32_i32 : i32 to vector<1x128xi32>
    %28 = arith.cmpi slt, %0, %27 : vector<1x128xi32>
    %cst_14 = arith.constant 0.000000e+00 : f32
    %29 = vector.broadcast %cst_14 : f32 to vector<32x128xf32>
    %30 = arith.maximumf %26, %29 : vector<32x128xf32>
    %31 = vector.shape_cast %28 : vector<1x128xi1> to vector<1x128xi1>
    %32 = vector.broadcast %31 : vector<1x128xi1> to vector<32x128xi1>
    %33 = arith.select %32, %30, %26 : vector<32x128xi1>, vector<32x128xf32>
    %34 = arith.truncf %33 : vector<32x128xf32> to vector<32x128xbf16>
    %c640 = arith.constant 640 : index
    %c0_15 = arith.constant 0 : index
    %35 = vector.load %arg2[%c640, %c0_15] : memref<896x128xbf16, #tpu.memory_space<vmem>>, vector<128x128xbf16>
    %cst_16 = arith.constant dense<0.000000e+00> : vector<32x128xf32>
    %36 = tpu.matmul %34, %35, %cst_16 {dimension_numbers = #tpu.dot_dimension_numbers<[1], [0], [0], [1], [0, 0, 1, 1], [], []>} : vector<32x128xbf16>, vector<128x128xbf16>, vector<32x128xf32> -> vector<32x128xf32>
    %c32_i32_17 = arith.constant 32 : i32
    %37 = vector.broadcast %c32_i32_17 : i32 to vector<1x128xi32>
    %38 = arith.cmpi slt, %0, %37 : vector<1x128xi32>
    %cst_18 = arith.constant 0.000000e+00 : f32
    %39 = vector.broadcast %cst_18 : f32 to vector<32x128xf32>
    %40 = arith.maximumf %36, %39 : vector<32x128xf32>
    %41 = vector.shape_cast %38 : vector<1x128xi1> to vector<1x128xi1>
    %42 = vector.broadcast %41 : vector<1x128xi1> to vector<32x128xi1>
    %43 = arith.select %42, %40, %36 : vector<32x128xi1>, vector<32x128xf32>
    %44 = arith.truncf %43 : vector<32x128xf32> to vector<32x128xbf16>
    %c768 = arith.constant 768 : index
    %c0_19 = arith.constant 0 : index
    %45 = vector.load %arg2[%c768, %c0_19] : memref<896x128xbf16, #tpu.memory_space<vmem>>, vector<128x128xbf16>
    %cst_20 = arith.constant dense<0.000000e+00> : vector<32x128xf32>
    %46 = tpu.matmul %44, %45, %cst_20 {dimension_numbers = #tpu.dot_dimension_numbers<[1], [0], [0], [1], [0, 0, 1, 1], [], []>} : vector<32x128xbf16>, vector<128x128xbf16>, vector<32x128xf32> -> vector<32x128xf32>
    %c0_21 = arith.constant 0 : index
    %c0_22 = arith.constant 0 : index
    %47 = vector.load %arg3[%c0_21, %c0_22] : memref<32x128xf32, #tpu.memory_space<vmem>>, vector<32x128xf32>
    tpu.vector_store %arg3[%c0_21, %c0_22], %46 {strides = array<i32>} : memref<32x128xf32, #tpu.memory_space<vmem>>, vector<32x128xf32>,
    return
  }
  func.func @transform_0(%arg0: i32) -> (i32, i32) {
    %c0_i32 = arith.constant 0 : i32
    %c0_i32_0 = arith.constant 0 : i32
    return %arg0, %c0_i32 : i32, i32
  }
  func.func @transform_1(%arg0: i32) -> (i32, i32) {
    %c0_i32 = arith.constant 0 : i32
    %c0_i32_0 = arith.constant 0 : i32
    %c0_i32_1 = arith.constant 0 : i32
    return %c0_i32, %c0_i32_0 : i32, i32
  }
  func.func @transform_2(%arg0: i32) -> (i32, i32) {
    %c0_i32 = arith.constant 0 : i32
    %c0_i32_0 = arith.constant 0 : i32
    return %arg0, %c0_i32 : i32, i32
  }
}

</mosaic_0001>

<bundles_post_ra>
// kernel: tpu_custom_call.1
= control target key start
LH: loop header
LB: loop body
LE: loop exit
PB: predicated region body
PF: predicated region fallthrough
CT: control target
= control target key end

     0   :  { %7 = vsyncpa [#allocation3], 0  ;;  %s1929_s0 = inlined_call_operand.hbm [shape: bf16[64,128], index: 0, kind: input, shape index: {}]   ;;  %s1930_s1 = inlined_call_operand.hbm [shape: bf16[896,128], index: 1, kind: input, shape index: {}]   ;;  %s1931_s2 = inlined_call_operand.hbm [shape: f32[64,128], index: 2, kind: output, shape index: {}]  }
   0x1   :  { %9 = vsyncpa [#allocation3 + $0x1], 0 }
   0x2   :  { %10 = vsyncpa [#allocation6], 0 }
   0x3   :  { %11 = vsyncpa [#allocation4], 0 }
   0x4   :  { %13 = vsyncpa [#allocation4 + $0x1], 0  ;;  %s1697_s9 = smov 0   ;;  %s1699_s10 = smov 0  }
   0x5   :  { %s1701_s11 = smov 0   ;;  %s1703_s12 = smov 0  }
   0x6 LB: > { %s1718_s13 = sadd.s32 4294967295, %s1673_s12   ;;  %s1140_s14 = sadd.s32 4294967294, %s1673_s12   ;;  %s1673_s12 = sphi %s1703_s12, %s1951_s12   ;;  %s1669_s11 = sphi %s1701_s11, %s1950_s11   ;;  %s1665_s10 = sphi %s1699_s10, %s1949_s10   ;;  %s1661_s9 = sphi %s1697_s9, %s1948_s9  }
   0x7   : > { %p39_p0 = scmp.ne.s32.totalorder %s1665_s10, %s1661_s9  ;;  %p1932_p1 = scmp.eq.s32.totalorder %s1718_s13, 0 }
   0x8   : > { %p90_p3 = scmp.eq.s32.totalorder %s1140_s14, 1  ;;  %p1141_p5 = scmp.ge.s32.totalorder %s1673_s12, 1 }
   0x9   : > { %p1727_p4 = por %p1932_p1, %p39_p0  ;;  %p97_p7 = scmp.lt.s32.totalorder %s1673_s12, 3 }
   0xa   : > { %p1732_p6 = por %p90_p3, %p39_p0  ;;  %s1675_s18 = smov [#allocation5]  }
   0xb   : > { %s1935_s15 = scalar_select %p1727_p4, 1, 0 }
   0xc   : > { %s1936_s16 = scalar_select %p1732_p6, 1, 0 }
   0xd   : > { %p1737_p8 = pnand %p1141_p5, %p97_p7  ;;  %s109_s19 = sshll.u32 %s1675_s18, 4  ;;  %s1741_s19 = int_to_ptr.vmem [resolvable:$true] %s109_s19 }
   0xe   : > { %s1753_s21 = sadd.s32 1, %s1673_s12   ;;  %s26_s22 = sadd.s32 1, %s1669_s11 }
   0xf   : > { %s1937_s17 = scalar_select %p1737_p8, 1, 0 }
  0x10   : > { %p1434_p9 = pneg %p1737_p8  ;;  %s23_s23 = ssub.s32 %s1673_s12, %s1753_s21 }
  0x11   : > { %s1545_s26 = scalar_lea.hbm %s1930_s1, 7168 }
  0x12   : > { %p1748_p11 = pnand %p1434_p9, %p1932_p1  ;;  %p1546_p12 = scmp.ne.s32.totalorder %s1930_s1, %s1545_s26 }
  0x13   : > { %p1552_p5 = scmp.lt.u32.totalorder %s1545_s26, %s1930_s1 }
  0x14   : > { %p1547_p13 = pneg %p1748_p11 }
  0x16   : > { %p1548_p0 = pnand %p1547_p13, %p1546_p12 }
  0x18   : > { %p1549_p3 = pneg %p1548_p0 }
  0x1a   : > { %p1554_p7 = pnand %p1552_p5, %p1549_p3 }
  0x1c   : > { %1557 = shalt.err (!%p1554_p7)
}
  0x1d   : > { %s1558_s3 = scalar_lea.vmem %s1741_s19, 7168  ;;  %p1566_p2 = scmp.lt.s32.totalorder %s1741_s19, %s1741_s19 }
  0x1e   : > { %p1559_p9 = scmp.ne.s32.totalorder %s1741_s19, %s1558_s3  ;;  %p1567_p6 = scmp.lt.s32.totalorder %s1558_s3, %s1558_s3 }
  0x20   : > { %p1561_p10 = pnand %p1559_p9, %p1547_p13  ;;  %p1568_p4 = por %p1567_p6, %p1566_p2 }
  0x22   : > { %p1562_p1 = pneg %p1561_p10 }
  0x24   : > { %p1569_p8 = pnand %p1568_p4, %p1562_p1 }
  0x26   : > { %1572 = shalt.err (!%p1569_p8)
}
  0x27   : > { %s1676_s4 = smov 64   ;;  %s1677_s5 = smov 4  }
  0x28   : > { %1437 = dma.hbm_to_vmem [thread:$0]  (!%p1748_p11), %s1930_s1, 7168, %s1741_s19, [#allocation6], %s1676_s4, %s1676_s4, %s1677_s5  }
  0x29   : > { %p24_p1 = scmp.eq.s32.totalorder %s23_s23, 0  ;;  %p33_p2 = scmp.ne.s32.totalorder %s1669_s11, %s1665_s10 }
  0x2a   : > { %p34_p4 = scmp.eq.s32.totalorder %s1673_s12, 0  ;;  %p1447_p6 = scmp.lt.s32.totalorder %s1673_s12, 2 }
  0x2b   : > { %s1787_s8 = scalar_select %p24_p1, %s1669_s11, %s26_s22  }
  0x2c   : > { %p35_p8 = por %p34_p4, %p33_p2  ;;  %p1939_p10 = scmp.eq.s32.totalorder %s1718_s13, 1 }
  0x2d   : > { %s123_s18 = sand.u32 1, %s1669_s11   ;;  %s1214_s20 = sshll.u32 %s1673_s12, 8 }
  0x2e   : > { %p1791_p12 = por %p1939_p10, %p33_p2  ;;  %s1144_s24 = sshll.u32 %s123_s18, 4 }
  0x2f   : > { %s1800_s27 = scalar_lea.hbm %s1929_s0, %s1214_s20  ;;  %s127_s19 = scalar_lea.vmem [#allocation2], %s1144_s24 }
  0x30   : > { %s134_s22 = sshll.u32 %s127_s19, 4  ;;  %p1802_p11 = pnand %p1447_p6, %p35_p8  ;;  %s1806_s22 = int_to_ptr.vmem [resolvable:$true] %s134_s22 }
  0x31   : > { %s1808_s28 = scalar_lea.sflag [#allocation3], %s123_s18  ;;  %s1573_s29 = scalar_lea.hbm %s1800_s27, 256 }
  0x32   : > { %p1574_p13 = scmp.ne.s32.totalorder %s1800_s27, %s1573_s29  ;;  %p1575_p0 = pneg %p1802_p11 }
  0x33   : > { %s1578_s6 = scalar_lea.hbm %s1929_s0, 512  ;;  %p1579_p7 = scmp.lt.u32.totalorder %s1800_s27, %s1929_s0 }
  0x34   : > { %p1576_p3 = pnand %p1575_p0, %p1574_p13  ;;  %p1580_p9 = scmp.lt.u32.totalorder %s1578_s6, %s1573_s29 }
  0x35   : > { %p1582_p2 = scmp.lt.u32.totalorder %s1573_s29, %s1800_s27 }
  0x36   : > { %p1577_p5 = pneg %p1576_p3  ;;  %p1581_p1 = por %p1580_p9, %p1579_p7 }
  0x38   : > { %p1583_p4 = por %p1582_p2, %p1581_p1 }
  0x3a   : > { %p1584_p6 = pnand %p1583_p4, %p1577_p5 }
  0x3c   : > { %1587 = shalt.err (!%p1584_p6)
}
  0x3d   : > { %s1588_s18 = scalar_lea.vmem %s1806_s22, 256  ;;  %s1678_s24 = smov [#allocation2]  }
  0x3e   : > { %p1589_p8 = scmp.ne.s32.totalorder %s1806_s22, %s1588_s18  ;;  %s1593_s25 = sshll.u32 %s1678_s24, 4  ;;  %s1594_s25 = int_to_ptr.vmem [resolvable:$false] %s1593_s25 }
  0x3f   : > { %s1595_s26 = scalar_lea.vmem %s1594_s25, 512  ;;  %p1596_p3 = scmp.lt.s32.totalorder %s1806_s22, %s1594_s25 }
  0x40   : > { %p1591_p10 = pnand %p1589_p8, %p1575_p0  ;;  %p1597_p7 = scmp.lt.s32.totalorder %s1595_s26, %s1588_s18 }
  0x42   : > { %p1592_p13 = pneg %p1591_p10  ;;  %p1598_p9 = por %p1597_p7, %p1596_p3 }
  0x44   : > { %p1599_p1 = pnand %p1598_p9, %p1592_p13 }
  0x46   : > { %1602 = shalt.err (!%p1599_p1)
}
  0x47   : > { %1441 = dma.hbm_to_vmem [thread:$0]  (!%p1802_p11), %s1800_s27, 256, %s1806_s22, %s1808_s28, %s1676_s4, %s1676_s4, %s1677_s5  }
  0x48   : > { %p1942_p0 = scmp.ne.s32.totalorder %s1937_s17, 0 }
  0x49   : > { %s1842_s19 = sand.u32 (!%p1942_p0), 1, %s1665_s10   ;;  %p1943_p5 = scmp.ne.s32.totalorder (!%p1942_p0), %s1935_s15, 0 }
  0x4a   : > { %146 = sbr.rel (%p1942_p0) target bundleno = 1669 (0x685), region = 28  ;;  %s1148_s29 = sshll.u32 (!%p1942_p0), %s1842_s19, 4 }
  0x4b   : > { %s149_s30 = scalar_lea.sflag (!%p1942_p0), [#allocation3], %s1842_s19  ;;  %s1846_s3 = scalar_lea.vmem (!%p1942_p0), [#allocation2], %s1148_s29 }
  0x51   : > { %1648 = dma.done.wait (%p1943_p5), %s149_s30, 256  }
  0x52   : > { %1650 = vsyncadd (%p1943_p5), %s149_s30, 4294967040  ;;  %p1944_p11 = scmp.eq.s32.totalorder %s1718_s13, 0 }
  0x54   : > { %1652 = dma.done.wait (%p1944_p11), [#allocation6], 7168   ;;  %p1945_p2 = pmov %p1944_p11 }
  0x55   : > { %v1487_v0 = vld [vmem:[#allocation5] sm:$0xff]   ;;  %v1488_v1 = vld [vmem:[#allocation5 + $0x8] sm:$0xff]   ;;  %v1489_v2 = vld [vmem:[#allocation5 + $0x10] sm:$0xff]   ;;  %v180_v61 = vlaneseq  ;;  %s1150_s15 = sshll.u32 %s1842_s19, 5  ;;  %s1215_s5 = sshll.u32 %s1718_s13, 9 }
  0x56   : > { %1654 = vsyncadd (%p1945_p2), [#allocation6], 4294960128  ;;  %1286 = vmatprep.subr.bf16.mxu0 %v1487_v0  ;;  %v1490_v3 = vld [vmem:[#allocation5 + $0x18] sm:$0xff]   ;;  %v1495_v4 = vld [vmem:[%s1846_s3] sm:$0xff]   ;;  %s176_s17 = scalar_lea.vmem [#allocation7], %s1150_s15  ;;  %s1885_s23 = scalar_lea.hbm %s1931_s2, %s1215_s5 }
  0x57   : > { %1287 = vmatpush3.bf16.msra.mxu0 %v1487_v0  ;;  %1302 = vmatprep.mubr.bf16.mxu0 %v1495_v4  ;;  %v1497_v5 = vld [vmem:[#allocation5 + $0x40] sm:$0xff]   ;;  %v1498_v6 = vld [vmem:[#allocation5 + $0x48] sm:$0xff]   ;;  %v1499_v8 = vld [vmem:[#allocation5 + $0x50] sm:$0xff]   ;;  %v1858_v62 = vand.u32 127, %v180_v61  ;;  %s1057_s4 = sshll.u32 %s176_s17, 4  ;;  %s1044_s28 = scalar_lea.sflag [#allocation4], %s1842_s19  ;;  %s1880_s4 = int_to_ptr.vmem [resolvable:$true] %s1057_s4 }
  0x58   : > { %1288 = vmatprep.subr.bf16.mxu0 %v1488_v1  ;;  %v1491_v7 = vld [vmem:[#allocation5 + $0x20] sm:$0xff]   ;;  %1306 = vmatprep.subr.bf16.mxu1 %v1497_v5  ;;  %v1492_v9 = vld [vmem:[#allocation5 + $0x28] sm:$0xff]   ;;  %v1500_v10 = vld [vmem:[#allocation5 + $0x58] sm:$0xff]   ;;  %s1603_s13 = scalar_lea.vmem %s1880_s4, 512  ;;  %s1679_s6 = smov [#allocation7]  }
  0x59   : > { %1307 = vmatpush3.bf16.msra.mxu1 %v1497_v5  ;;  %v1493_v11 = vld [vmem:[#allocation5 + $0x30] sm:$0xff]   ;;  %v1501_v12 = vld [vmem:[#allocation5 + $0x60] sm:$0xff]   ;;  %v1494_v13 = vld [vmem:[#allocation5 + $0x38] sm:$0xff]   ;;  %vm549_vm0 = vcmp.lt.s32.totalorder %v1858_v62, 24  ;;  %vm790_vm1 = vcmp.lt.s32.totalorder %v1858_v62, 32  ;;  %p1604_p4 = scmp.ne.s32.totalorder %s1880_s4, %s1603_s13  ;;  %s1607_s7 = sshll.u32 %s1679_s6, 4  ;;  %s1608_s7 = int_to_ptr.vmem [resolvable:$false] %s1607_s7 }
  0x5a   : > { %1308 = vmatprep.subr.bf16.mxu1 %v1498_v6  ;;  %v1502_v14 = vld [vmem:[#allocation5 + $0x68] sm:$0xff]   ;;  %v1503_v16 = vld [vmem:[#allocation5 + $0x70] sm:$0xff]   ;;  %v1504_v17 = vld [vmem:[#allocation5 + $0x78] sm:$0xff]   ;;  %s1609_s20 = scalar_lea.vmem %s1608_s7, 1024  ;;  %p1610_p10 = scmp.lt.s32.totalorder %s1880_s4, %s1608_s7 }
  0x5b   : > { %1289 = vmatpush3.bf16.msra.mxu0 %v1488_v1  ;;  %v1496_v15 = vld [vmem:[%s1846_s3 + $0x8] sm:$0xff]   ;;  %v1505_v18 = vld [vmem:[#allocation5 + $0x80] sm:$0xff]   ;;  %v1507_v20 = vld [vmem:[#allocation5 + $0x90] sm:$0xff]   ;;  %p1605_p6 = pnand %p1604_p4, %p1791_p12  ;;  %p1611_p13 = scmp.lt.s32.totalorder %s1609_s20, %s1603_s13 }
  0x5c   : > { %1290 = vmatprep.subr.bf16.mxu0 %v1489_v2  ;;  %v1506_v19 = vld [vmem:[#allocation5 + $0x88] sm:$0xff]   ;;  %v1508_v21 = vld [vmem:[#allocation5 + $0x98] sm:$0xff]   ;;  %v1509_v22 = vld [vmem:[#allocation5 + $0xa0] sm:$0xff]  }
  0x5d   : > { %1309 = vmatpush3.bf16.msra.mxu1 %v1498_v6  ;;  %v1510_v23 = vld [vmem:[#allocation5 + $0xa8] sm:$0xff]   ;;  %v1511_v34 = vld [vmem:[#allocation5 + $0xb0] sm:$0xff]   ;;  %v1512_v35 = vld [vmem:[#allocation5 + $0xb8] sm:$0xff]   ;;  %p1606_p8 = pneg %p1605_p6  ;;  %p1612_p3 = por %p1611_p13, %p1610_p10 }
  0x5e   : > { %1310 = vmatprep.subr.bf16.mxu1 %v1499_v8  ;;  %v1513_v36 = vld [vmem:[#allocation5 + $0xc0] sm:$0xff]   ;;  %v1514_v37 = vld [vmem:[#allocation5 + $0xc8] sm:$0xff]   ;;  %v1515_v38 = vld [vmem:[#allocation5 + $0xd0] sm:$0xff]  }
  0x5f   : > { %1291 = vmatpush3.bf16.msra.mxu0 %v1489_v2  ;;  %v1516_v39 = vld [vmem:[#allocation5 + $0xd8] sm:$0xff]   ;;  %v1517_v40 = vld [vmem:[#allocation5 + $0xe0] sm:$0xff]   ;;  %v1518_v41 = vld [vmem:[#allocation5 + $0xe8] sm:$0xff]   ;;  %p1613_p7 = pnand %p1612_p3, %p1606_p8 }
  0x60   : > { %1292 = vmatprep.subr.bf16.mxu0 %v1490_v3  ;;  %v1519_v52 = vld [vmem:[#allocation5 + $0xf0] sm:$0xff]   ;;  %v1520_v53 = vld [vmem:[#allocation5 + $0xf8] sm:$0xff]   ;;  %v1521_v54 = vld [vmem:[#allocation5 + $0x100] sm:$0xff]  }
  0x61   : > { %1311 = vmatpush3.bf16.msra.mxu1 %v1499_v8  ;;  %v1522_v55 = vld [vmem:[#allocation5 + $0x108] sm:$0xff]   ;;  %v1523_v56 = vld [vmem:[#allocation5 + $0x110] sm:$0xff]   ;;  %v1524_v57 = vld [vmem:[#allocation5 + $0x118] sm:$0xff]  }
  0x62   : > { %1312 = vmatprep.subr.bf16.mxu1 %v1500_v10  ;;  %v1525_v58 = vld [vmem:[#allocation5 + $0x120] sm:$0xff]   ;;  %v1526_v59 = vld [vmem:[#allocation5 + $0x128] sm:$0xff]   ;;  %v1527_v60 = vld [vmem:[#allocation5 + $0x130] sm:$0xff]  }
  0x63   : > { %1293 = vmatpush3.bf16.msra.mxu0 %v1490_v3 }
  0x64   : > { %1294 = vmatprep.subr.bf16.mxu0 %v1491_v7 }
  0x65   : > { %1313 = vmatpush3.bf16.msra.mxu1 %v1500_v10 }
  0x66   : > { %1314 = vmatprep.subr.bf16.mxu1 %v1501_v12 }
  0x67   : > { %1295 = vmatpush3.bf16.msra.mxu0 %v1491_v7 }
  0x68   : > { %1296 = vmatprep.subr.bf16.mxu0 %v1492_v9 }
  0x69   : > { %1315 = vmatpush3.bf16.msra.mxu1 %v1501_v12 }
  0x6a   : > { %1316 = vmatprep.subr.bf16.mxu1 %v1502_v14 }
  0x6b   : > { %1297 = vmatpush3.bf16.msra.mxu0 %v1492_v9 }
  0x6c   : > { %1298 = vmatprep.subr.bf16.mxu0 %v1493_v11 }
  0x6d   : > { %1317 = vmatpush3.bf16.msra.mxu1 %v1502_v14  ;;  %v1529_v14 = vld [vmem:[#allocation5 + $0x140] sm:$0xff]  }
  0x6e   : > { %1318 = vmatprep.subr.bf16.mxu1 %v1503_v16 }
  0x6f   : > { %1299 = vmatpush3.bf16.msra.mxu0 %v1493_v11 }
  0x70   : > { %1300 = vmatprep.subr.bf16.mxu0 %v1494_v13 }
  0x71   : > { %1319 = vmatpush3.bf16.msra.mxu1 %v1503_v16  ;;  %v1531_v16 = vld [vmem:[#allocation5 + $0x150] sm:$0xff]  }
  0x72   : > { %1320 = vmatprep.subr.bf16.mxu1 %v1504_v17 }
  0x73   : > { %1301 = vmatpush3.bf16.msra.mxu0 %v1494_v13  ;;  %v1528_v13 = vld [vmem:[#allocation5 + $0x138] sm:$0xff]  }
  0x74   : > { %1326 = vmatprep.subr.bf16.mxu0 %v1505_v18 }
  0x75   : > { %1321 = vmatpush3.bf16.msra.mxu1 %v1504_v17  ;;  %v1532_v17 = vld [vmem:[#allocation5 + $0x158] sm:$0xff]  }
  0x76   : > { %1303 = vmatmul.mubr.bf16.vlgmr.msra.gmra.mrb[0].mxu0 %v1496_v15  ;;  %1346 = vmatprep.subr.bf16.mxu1 %v1513_v36  ;;  %v1530_v15 = vld [vmem:[#allocation5 + $0x148] sm:$0xff]  }
  0x77   : > { %1327 = vmatpush3.bf16.msra.mxu0 %v1505_v18  ;;  %v1533_v18 = vld [vmem:[#allocation5 + $0x160] sm:$0xff]  }
  0x78   : > { %1328 = vmatprep.subr.bf16.mxu0 %v1506_v19 }
  0x7b   : > { %1329 = vmatpush3.bf16.msra.mxu0 %v1506_v19  ;;  %v1534_v19 = vld [vmem:[#allocation5 + $0x168] sm:$0xff]  }
  0x7c   : > { %1330 = vmatprep.subr.bf16.mxu0 %v1507_v20 }
  0x7f   : > { %1331 = vmatpush3.bf16.msra.mxu0 %v1507_v20 }
  0x80   : > { %1332 = vmatprep.subr.bf16.mxu0 %v1508_v21 }
  0x83   : > { %1333 = vmatpush3.bf16.msra.mxu0 %v1508_v21 }
  0x84   : > { %1334 = vmatprep.subr.bf16.mxu0 %v1509_v22 }
  0x87   : > { %1335 = vmatpush3.bf16.msra.mxu0 %v1509_v22 }
  0x88   : > { %1336 = vmatprep.subr.bf16.mxu0 %v1510_v23 }
  0x8b   : > { %1337 = vmatpush3.bf16.msra.mxu0 %v1510_v23 }
  0x8c   : > { %1338 = vmatprep.subr.bf16.mxu0 %v1511_v34 }
  0x8f   : > { %1339 = vmatpush3.bf16.msra.mxu0 %v1511_v34 }
  0x90   : > { %1340 = vmatprep.subr.bf16.mxu0 %v1512_v35 }
  0x93   : > { %1341 = vmatpush3.bf16.msra.mxu0 %v1512_v35 }
  0x94   : > { %1366 = vmatprep.subr.bf16.mxu0 %v1521_v54 }
 0x149   : > { %v1304_v24 = vpop.f32.mrb[0].mxu0 }
 0x14a   : > { %v296_v25 = vpop.f32.mrb[1].mxu0  ;;  %v313_v27 = vmax.f32 %v1304_v24, 0.0 }
 0x14b   : > { %v1305_v26 = vpop.f32.mrb[2].mxu0  ;;  %v311_v30 = vmax.f32 %v296_v25, 0.0 }
 0x14c   : > { %v314_v28 = vmax.f32 %v1305_v26, 0.0  ;;  %v299_v29 = vpop.f32.mrb[3].mxu0  ;;  %v1535_v26 = vld [vmem:[#allocation5 + $0x170] sm:$0xff]  }
 0x14d   : > { %v312_v31 = vmax.f32 %v299_v29, 0.0  ;;  %v1538_v29 = vld [vmem:[#allocation5 + $0x188] sm:$0xff]  }
 0x14e   : > { %v316_v32 = vpack.c.bf16 %v314_v28, %v313_v27  ;;  %v1536_v27 = vld [vmem:[#allocation5 + $0x178] sm:$0xff]   ;;  %v1537_v28 = vld [vmem:[#allocation5 + $0x180] sm:$0xff]  }
 0x14f   : > { %v315_v33 = vpack.c.bf16 %v312_v31, %v311_v30  ;;  %v1539_v30 = vld [vmem:[#allocation5 + $0x190] sm:$0xff]   ;;  %v1540_v31 = vld [vmem:[#allocation5 + $0x198] sm:$0xff]  }
 0x151   : > { %1322 = vmatprep.mubr.bf16.mxu1 %v315_v33  ;;  %v1542_v33 = vld [vmem:[#allocation5 + $0x1a8] sm:$0xff]  }
 0x152   : > { %1323 = vmatmul.mubr.bf16.vlgmr.msra.gmra.mrb[0].mxu1 %v316_v32  ;;  %v1541_v32 = vld [vmem:[#allocation5 + $0x1a0] sm:$0xff]  }
 0x153   : > { %1347 = vmatpush3.bf16.msra.mxu1 %v1513_v36 }
 0x154   : > { %1348 = vmatprep.subr.bf16.mxu1 %v1514_v37 }
 0x157   : > { %1349 = vmatpush3.bf16.msra.mxu1 %v1514_v37 }
 0x158   : > { %1350 = vmatprep.subr.bf16.mxu1 %v1515_v38 }
 0x15b   : > { %1351 = vmatpush3.bf16.msra.mxu1 %v1515_v38 }
 0x15c   : > { %1352 = vmatprep.subr.bf16.mxu1 %v1516_v39 }
 0x15f   : > { %1353 = vmatpush3.bf16.msra.mxu1 %v1516_v39 }
 0x160   : > { %1354 = vmatprep.subr.bf16.mxu1 %v1517_v40 }
 0x163   : > { %1355 = vmatpush3.bf16.msra.mxu1 %v1517_v40 }
 0x164   : > { %1356 = vmatprep.subr.bf16.mxu1 %v1518_v41 }
 0x167   : > { %1357 = vmatpush3.bf16.msra.mxu1 %v1518_v41 }
 0x168   : > { %1358 = vmatprep.subr.bf16.mxu1 %v1519_v52 }
 0x16b   : > { %1359 = vmatpush3.bf16.msra.mxu1 %v1519_v52 }
 0x16c   : > { %1360 = vmatprep.subr.bf16.mxu1 %v1520_v53 }
 0x16f   : > { %1361 = vmatpush3.bf16.msra.mxu1 %v1520_v53 }
 0x170   : > { %1386 = vmatprep.subr.bf16.mxu1 %v1529_v14 }
 0x225   : > { %v1324_v42 = vpop.f32.mrb[0].mxu1 }
 0x226   : > { %v415_v43 = vpop.f32.mrb[1].mxu1  ;;  %v432_v45 = vmax.f32 %v1324_v42, 0.0 }
 0x227   : > { %v1325_v44 = vpop.f32.mrb[2].mxu1  ;;  %v430_v48 = vmax.f32 %v415_v43, 0.0 }
 0x228   : > { %v433_v46 = vmax.f32 %v1325_v44, 0.0  ;;  %v418_v47 = vpop.f32.mrb[3].mxu1 }
 0x229   : > { %v431_v49 = vmax.f32 %v418_v47, 0.0 }
 0x22a   : > { %v435_v50 = vpack.c.bf16 %v433_v46, %v432_v45 }
 0x22b   : > { %v434_v51 = vpack.c.bf16 %v431_v49, %v430_v48  ;;  %v1543_v48 = vld [vmem:[#allocation5 + $0x1b0] sm:$0xff]   ;;  %v1544_v49 = vld [vmem:[#allocation5 + $0x1b8] sm:$0xff]  }
 0x22d   : > { %1342 = vmatprep.mubr.bf16.mxu0 %v434_v51 }
 0x22e   : > { %1343 = vmatmul.mubr.bf16.vlgmr.msra.gmra.mrb[4].mxu0 %v435_v50 }
 0x22f   : > { %1367 = vmatpush3.bf16.msra.mxu0 %v1521_v54 }
 0x230   : > { %1368 = vmatprep.subr.bf16.mxu0 %v1522_v55 }
 0x233   : > { %1369 = vmatpush3.bf16.msra.mxu0 %v1522_v55 }
 0x234   : > { %1370 = vmatprep.subr.bf16.mxu0 %v1523_v56 }
 0x237   : > { %1371 = vmatpush3.bf16.msra.mxu0 %v1523_v56 }
 0x238   : > { %1372 = vmatprep.subr.bf16.mxu0 %v1524_v57 }
 0x23b   : > { %1373 = vmatpush3.bf16.msra.mxu0 %v1524_v57 }
 0x23c   : > { %1374 = vmatprep.subr.bf16.mxu0 %v1525_v58 }
 0x23f   : > { %1375 = vmatpush3.bf16.msra.mxu0 %v1525_v58 }
 0x240   : > { %1376 = vmatprep.subr.bf16.mxu0 %v1526_v59 }
 0x243   : > { %1377 = vmatpush3.bf16.msra.mxu0 %v1526_v59 }
 0x244   : > { %1378 = vmatprep.subr.bf16.mxu0 %v1527_v60 }
 0x247   : > { %1379 = vmatpush3.bf16.msra.mxu0 %v1527_v60 }
 0x248   : > { %1380 = vmatprep.subr.bf16.mxu0 %v1528_v13 }
 0x24b   : > { %1381 = vmatpush3.bf16.msra.mxu0 %v1528_v13 }
 0x24c   : > { %1406 = vmatprep.subr.bf16.mxu0 %v1537_v28 }
 0x301   : > { %v1344_v63 = vpop.f32.mrb[4].mxu0 }
 0x302   : > { %v552_v0 = vmax.f32 %v1344_v63, 0.0  ;;  %v534_v1 = vpop.f32.mrb[5].mxu0 }
 0x303   : > { %v550_v2 = vmax.f32 %v534_v1, 0.0  ;;  %v1345_v3 = vpop.f32.mrb[6].mxu0 }
 0x304   : > { %v553_v4 = vmax.f32 %v1345_v3, 0.0  ;;  %v537_v5 = vpop.f32.mrb[7].mxu0  ;;  %v558_v7 = vsel %vm549_vm0, %v552_v0, %v1344_v63 }
 0x305   : > { %v551_v6 = vmax.f32 %v537_v5, 0.0  ;;  %v556_v9 = vsel %vm549_vm0, %v550_v2, %v534_v1 }
 0x306   : > { %v559_v8 = vsel %vm549_vm0, %v553_v4, %v1345_v3 }
 0x307   : > { %v561_v10 = vpack.c.bf16 %v559_v8, %v558_v7  ;;  %v557_v11 = vsel %vm549_vm0, %v551_v6, %v537_v5 }
 0x308   : > { %v560_v12 = vpack.c.bf16 %v557_v11, %v556_v9 }
 0x30a   : > { %1362 = vmatprep.mubr.bf16.mxu1 %v560_v12 }
 0x30b   : > { %1363 = vmatmul.mubr.bf16.vlgmr.msra.gmra.mrb[4].mxu1 %v561_v10 }
 0x30c   : > { %1387 = vmatpush3.bf16.msra.mxu1 %v1529_v14 }
 0x30d   : > { %1388 = vmatprep.subr.bf16.mxu1 %v1530_v15 }
 0x310   : > { %1389 = vmatpush3.bf16.msra.mxu1 %v1530_v15 }
 0x311   : > { %1390 = vmatprep.subr.bf16.mxu1 %v1531_v16 }
 0x314   : > { %1391 = vmatpush3.bf16.msra.mxu1 %v1531_v16 }
 0x315   : > { %1392 = vmatprep.subr.bf16.mxu1 %v1532_v17 }
 0x318   : > { %1393 = vmatpush3.bf16.msra.mxu1 %v1532_v17 }
 0x319   : > { %1394 = vmatprep.subr.bf16.mxu1 %v1533_v18 }
 0x31c   : > { %1395 = vmatpush3.bf16.msra.mxu1 %v1533_v18 }
 0x31d   : > { %1396 = vmatprep.subr.bf16.mxu1 %v1534_v19 }
 0x320   : > { %1397 = vmatpush3.bf16.msra.mxu1 %v1534_v19 }
 0x321   : > { %1398 = vmatprep.subr.bf16.mxu1 %v1535_v26 }
 0x324   : > { %1399 = vmatpush3.bf16.msra.mxu1 %v1535_v26 }
 0x325   : > { %1400 = vmatprep.subr.bf16.mxu1 %v1536_v27 }
 0x328   : > { %1401 = vmatpush3.bf16.msra.mxu1 %v1536_v27 }
 0x3de   : > { %v1364_v20 = vpop.f32.mrb[4].mxu1 }
 0x3df   : > { %v660_v21 = vpop.f32.mrb[5].mxu1 }
 0x3e0   : > { %v1365_v22 = vpop.f32.mrb[6].mxu1 }
 0x3e1   : > { %v676_v23 = vpack.c.bf16 %v1365_v22, %v1364_v20  ;;  %v663_v24 = vpop.f32.mrb[7].mxu1 }
 0x3e2   : > { %v675_v25 = vpack.c.bf16 %v663_v24, %v660_v21 }
 0x3e4   : > { %1382 = vmatprep.mubr.bf16.mxu0 %v675_v25 }
 0x3e5   : > { %1383 = vmatmul.mubr.bf16.vlgmr.msra.gmra.mrb[8].mxu0 %v676_v23 }
 0x3e6   : > { %1407 = vmatpush3.bf16.msra.mxu0 %v1537_v28 }
 0x3e7   : > { %1408 = vmatprep.subr.bf16.mxu0 %v1538_v29 }
 0x3ea   : > { %1409 = vmatpush3.bf16.msra.mxu0 %v1538_v29 }
 0x3eb   : > { %1410 = vmatprep.subr.bf16.mxu0 %v1539_v30 }
 0x3ee   : > { %1411 = vmatpush3.bf16.msra.mxu0 %v1539_v30 }
 0x3ef   : > { %1412 = vmatprep.subr.bf16.mxu0 %v1540_v31 }
 0x3f2   : > { %1413 = vmatpush3.bf16.msra.mxu0 %v1540_v31 }
 0x3f3   : > { %1414 = vmatprep.subr.bf16.mxu0 %v1541_v32 }
 0x3f6   : > { %1415 = vmatpush3.bf16.msra.mxu0 %v1541_v32 }
 0x3f7   : > { %1416 = vmatprep.subr.bf16.mxu0 %v1542_v33 }
 0x3fa   : > { %1417 = vmatpush3.bf16.msra.mxu0 %v1542_v33 }
 0x3fb   : > { %1418 = vmatprep.subr.bf16.mxu0 %v1543_v48 }
 0x3fe   : > { %1419 = vmatpush3.bf16.msra.mxu0 %v1543_v48 }
 0x3ff   : > { %1420 = vmatprep.subr.bf16.mxu0 %v1544_v49 }
 0x402   : > { %1421 = vmatpush3.bf16.msra.mxu0 %v1544_v49 }
 0x4b8   : > { %v1384_v34 = vpop.f32.mrb[8].mxu0 }
 0x4b9   : > { %v793_v35 = vmax.f32 %v1384_v34, 0.0  ;;  %v775_v36 = vpop.f32.mrb[9].mxu0 }
 0x4ba   : > { %v791_v37 = vmax.f32 %v775_v36, 0.0  ;;  %v1385_v38 = vpop.f32.mrb[10].mxu0 }
 0x4bb   : > { %v794_v39 = vmax.f32 %v1385_v38, 0.0  ;;  %v778_v40 = vpop.f32.mrb[11].mxu0  ;;  %v799_v42 = vsel %vm790_vm1, %v793_v35, %v1384_v34 }
 0x4bc   : > { %v792_v41 = vmax.f32 %v778_v40, 0.0  ;;  %v797_v44 = vsel %vm790_vm1, %v791_v37, %v775_v36 }
 0x4bd   : > { %v800_v43 = vsel %vm790_vm1, %v794_v39, %v1385_v38 }
 0x4be   : > { %v802_v45 = vpack.c.bf16 %v800_v43, %v799_v42  ;;  %v798_v46 = vsel %vm790_vm1, %v792_v41, %v778_v40 }
 0x4bf   : > { %v801_v47 = vpack.c.bf16 %v798_v46, %v797_v44 }
 0x4c1   : > { %1402 = vmatprep.mubr.bf16.mxu1 %v801_v47 }
 0x4c2   : > { %1403 = vmatmul.mubr.bf16.vlgmr.msra.gmra.mrb[8].mxu1 %v802_v45 }
 0x595   : > { %v1404_v50 = vpop.f32.mrb[8].mxu1 }
 0x596   : > { %v918_v51 = vmax.f32 %v1404_v50, 0.0  ;;  %v901_v52 = vpop.f32.mrb[9].mxu1 }
 0x597   : > { %v916_v53 = vmax.f32 %v901_v52, 0.0  ;;  %v1405_v54 = vpop.f32.mrb[10].mxu1 }
 0x598   : > { %v919_v55 = vmax.f32 %v1405_v54, 0.0  ;;  %v904_v56 = vpop.f32.mrb[11].mxu1  ;;  %v922_v58 = vsel %vm790_vm1, %v918_v51, %v1404_v50 }
 0x599   : > { %v917_v57 = vmax.f32 %v904_v56, 0.0  ;;  %v920_v60 = vsel %vm790_vm1, %v916_v53, %v901_v52 }
 0x59a   : > { %v923_v59 = vsel %vm790_vm1, %v919_v55, %v1405_v54 }
 0x59b   : > { %v925_v61 = vpack.c.bf16 %v923_v59, %v922_v58  ;;  %v921_v63 = vsel %vm790_vm1, %v917_v57, %v904_v56 }
 0x59c   : > { %v924_v0 = vpack.c.bf16 %v921_v63, %v920_v60 }
 0x59e   : > { %1422 = vmatprep.mubr.bf16.mxu0 %v924_v0 }
 0x59f   : > { %1423 = vmatmul.mubr.bf16.vlgmr.msra.gmra.mrb[12].mxu0 %v925_v61 }
 0x672   : > { %v1424_v1 = vpop.f32.mrb[12].mxu0 }
 0x673   : > { %1041 = vst [vmem:[%s176_s17 + $0x10] sm:$0xff] %v1424_v1  ;;  %v1024_v2 = vpop.f32.mrb[13].mxu0 }
 0x674   : > { %1039 = vst [vmem:[%s176_s17] sm:$0xff] %v1024_v2  ;;  %v1425_v62 = vpop.f32.mrb[14].mxu0 }
 0x675   : > { %1042 = vst [vmem:[%s176_s17 + $0x18] sm:$0xff] %v1425_v62  ;;  %v1027_v3 = vpop.f32.mrb[15].mxu0 }
 0x676   : > { %1040 = vst [vmem:[%s176_s17 + $0x8] sm:$0xff] %v1027_v3 }
 0x677   : > { %1616 = shalt.err (!%p1613_p7)
}
 0x678   : > { %s1617_s18 = scalar_lea.hbm %s1885_s23, 512  ;;  %s1621_s26 = scalar_lea.hbm %s1931_s2, 1024 }
 0x679   : > { %p1618_p9 = scmp.ne.s32.totalorder %s1885_s23, %s1617_s18  ;;  %p1622_p5 = scmp.lt.u32.totalorder %s1885_s23, %s1931_s2 }
 0x67a   : > { %p1623_p11 = scmp.lt.u32.totalorder %s1621_s26, %s1617_s18  ;;  %p1625_p4 = scmp.lt.u32.totalorder %s1617_s18, %s1885_s23 }
 0x67b   : > { %p1619_p1 = pnand %p1618_p9, %p1791_p12 }
 0x67c   : > { %p1624_p2 = por %p1623_p11, %p1622_p5 }
 0x67d   : > { %p1620_p0 = pneg %p1619_p1 }
 0x67e   : > { %p1626_p6 = por %p1625_p4, %p1624_p2 }
 0x680   : > { %p1627_p8 = pnand %p1626_p6, %p1620_p0 }
 0x682   : > { %1630 = shalt.err (!%p1627_p8)
}
 0x683   : > { %s1680_s3 = smov 128   ;;  %s1681_s15 = smov 8  }
 0x684   : > { %1432 = dma.vmem_to_hbm [thread:$0]  (%p1791_p12), %s1880_s4, 512, %s1885_s23, %s1044_s28, %s1680_s3, %s1680_s3, %s1681_s15  }
 0x685 PF: > { %s1072_s17 = sand.u32 1, %s1661_s9   ;;  %p1946_p10 = scmp.ne.s32.totalorder %s1936_s16, 0 }
 0x686   : > { %p1947_p13 = scmp.ge.s32.totalorder %s1673_s12, 2  ;;  %s1073_s5 = scalar_lea.sflag [#allocation4], %s1072_s17 }
 0x688   : > { %p1443_p3 = pnand %p1947_p13, %p1946_p10 }
 0x68a   : > { %1656 = dma.done.wait (!%p1443_p3), %s1073_s5, 512  }
 0x68b   : > { %1658 = vsyncadd (!%p1443_p3), %s1073_s5, 4294966784  ;;  %p16_p7 = scmp.ge.s32.totalorder %s1753_s21, 4   ;;  %s1948_s9 = smov %s1665_s10 }
 0x68c   : > { %s1949_s10 = smov %s1669_s11  ;;  %s1950_s11 = smov %s1787_s8 }
 0x68d   : > { %s1951_s12 = smov %s1753_s21  ;;  %18 = sbr.rel (!%p16_p7) target bundleno = 6 (0x6), region = 77 }
 0x694   :  { %1078 = vsyncpa [#allocation3], 1 }
 0x695   :  { %1080 = vsyncpa [#allocation3 + $0x1], 1 }
 0x696   :  { %1081 = vsyncpa [#allocation6], 1 }
 0x697   :  { %1082 = vsyncpa [#allocation4], 1 }
 0x698   :  { %1084 = vsyncpa [#allocation4 + $0x1], 1 }

</bundles_post_ra>
